<compile_context>
chip_gen: v6e
topology: v6e:2x2x1
jax: 0.10.0
libtpu: 0.0.40
codegen_flags: <defaults>
</compile_context>

<pallas_src>
import jax
import jax.numpy as jnp
from jax.experimental import pallas as pl
from jax.experimental.pallas import tpu as pltpu

_LANES = 1024          # lane-dense last dim (multiple of 128)
_TM_MAX = 512          # rows per block -> 512*1024*4B = 2 MiB per f32 block


def _residual_block_kernel(x_ref, o_ref):
    x = x_ref[...]
    # self.shortcut = nn.Identity(); applied when in_channels != out_channels,
    # otherwise residual = x directly. Both paths are the identity.
    residual = x
    # self.blocks = nn.Identity()
    blocks_out = x
    # x += residual
    o_ref[...] = blocks_out + residual


def _round_up(a, b):
    return ((a + b - 1) // b) * b


def residual_block_forward(x, in_channels, out_channels):
    """Pallas implementation of ResidualBlock.forward.

    x: (N, C, H, W) array (NCHW). Returns array of same shape/dtype.
    """
    assert x.shape[1] == in_channels
    orig_shape = x.shape
    total = x.size

    # apply_shortcut property — the shortcut is Identity, so it does not change
    # the math, but we keep the branch to mirror the module exactly.
    apply_shortcut = in_channels != out_channels  # noqa: F841 (identity either way)

    # Sublane packing for the second-to-last block dim (8 rows for 32-bit,
    # 16 for 16-bit, 32 for 8-bit dtypes).
    itemsize = jnp.dtype(x.dtype).itemsize
    sublane = {4: 8, 2: 16, 1: 32}.get(itemsize, 8)

    # Lane-dense flatten: pad the flat tensor so it reshapes to (rows, _LANES)
    # with rows an exact multiple of the row-tile TM.
    rows_raw = pl.cdiv(total, _LANES)
    tm = min(_TM_MAX, _round_up(rows_raw, sublane))
    rows = _round_up(rows_raw, tm)
    padded_total = rows * _LANES

    flat = x.reshape(-1)
    if padded_total != total:
        flat = jnp.pad(flat, (0, padded_total - total))
    x2d = flat.reshape(rows, _LANES)

    grid = (rows // tm,)

    out2d = pl.pallas_call(
        _residual_block_kernel,
        out_shape=jax.ShapeDtypeStruct((rows, _LANES), x.dtype),
        grid_spec=pltpu.PrefetchScalarGridSpec(
            num_scalar_prefetch=0,
            grid=grid,
            in_specs=[pl.BlockSpec((tm, _LANES), lambda i: (i, 0))],
            out_specs=pl.BlockSpec((tm, _LANES), lambda i: (i, 0)),
        ),
        compiler_params=pltpu.CompilerParams(
            dimension_semantics=("parallel",),
            vmem_limit_bytes=32 * 1024 * 1024,
        ),
    )(x2d)

    return out2d.reshape(-1)[:total].reshape(orig_shape)


if __name__ == "__main__":
    key = jax.random.PRNGKey(0)

    # Primary test: small NCHW input consistent with the module.
    N, C, H, W = 2, 4, 16, 16
    x = jax.random.normal(key, (N, C, H, W), dtype=jnp.float32)
    out = residual_block_forward(x, in_channels=C, out_channels=C)
    out = jax.block_until_ready(out)
    ref = x + x
    assert out.shape == x.shape and out.dtype == x.dtype
    assert jnp.allclose(out, ref, atol=1e-6), "mismatch vs reference"

    # Secondary test: non-128-aligned spatial size exercises the lane-dense
    # pad/unpad path (the in_channels != out_channels branch is also Identity).
    x2 = jax.random.normal(jax.random.PRNGKey(1), (2, 8, 14, 14), dtype=jnp.float32)
    out2 = residual_block_forward(x2, in_channels=8, out_channels=16)
    out2 = jax.block_until_ready(out2)
    assert out2.shape == x2.shape and out2.dtype == x2.dtype
    assert jnp.allclose(out2, x2 + x2, atol=1e-6), "mismatch vs reference (padded path)"

    print("KERNEL_OK")
</pallas_src>

<mosaic_0001>
module attributes {stable_mosaic.version = 11 : i64} {
  func.func @_residual_block_kernel(%arg0: i32, %arg1: memref<8x1024xf32, #tpu.memory_space<vmem>>, %arg2: memref<8x1024xf32, #tpu.memory_space<vmem>>) attributes {dimension_semantics = [#tpu.dimension_semantics<parallel>], iteration_bounds = array<i64: 1>, scalar_prefetch = 0 : i64, scratch_operands = 0 : i64, tpu.core_type = #tpu.core_type<tc>, window_params = [{transform_indices = @transform_0, window_bounds = array<i64: 8, 1024>}, {transform_indices = @transform_1, window_bounds = array<i64: 8, 1024>}]} {
    %c0 = arith.constant 0 : index
    %c0_0 = arith.constant 0 : index
    %0 = vector.load %arg1[%c0, %c0_0] : memref<8x1024xf32, #tpu.memory_space<vmem>>, vector<8x1024xf32>
    %1 = arith.addf %0, %0 : vector<8x1024xf32>
    %c0_1 = arith.constant 0 : index
    %c0_2 = arith.constant 0 : index
    %2 = vector.load %arg2[%c0_1, %c0_2] : memref<8x1024xf32, #tpu.memory_space<vmem>>, vector<8x1024xf32>
    tpu.vector_store %arg2[%c0_1, %c0_2], %1 {strides = array<i32>} : memref<8x1024xf32, #tpu.memory_space<vmem>>, vector<8x1024xf32>,
    return
  }
  func.func @transform_0(%arg0: i32) -> (i32, i32) {
    %c0_i32 = arith.constant 0 : i32
    %c0_i32_0 = arith.constant 0 : i32
    return %arg0, %c0_i32 : i32, i32
  }
  func.func @transform_1(%arg0: i32) -> (i32, i32) {
    %c0_i32 = arith.constant 0 : i32
    %c0_i32_0 = arith.constant 0 : i32
    return %arg0, %c0_i32 : i32, i32
  }
}

</mosaic_0001>

<bundles_post_ra>
// kernel: tpu_custom_call.1
= control target key start
LH: loop header
LB: loop body
LE: loop exit
PB: predicated region body
PF: predicated region fallthrough
CT: control target
= control target key end

     0   :  { %6 = vsyncpa [#allocation3], 0  ;;  %s124_s0 = inlined_call_operand.hbm [shape: f32[8,1024], index: 0, kind: input, shape index: {}]   ;;  %s125_s1 = inlined_call_operand.hbm [shape: f32[8,1024], index: 1, kind: output, shape index: {}]  }
   0x1   :  { %7 = vsyncpa [#allocation4], 0  ;;  %s106_s6 = smov [#allocation2]  }
   0x2   :  { %s14_s7 = sshll.u32 %s106_s6, 4  ;;  %s15_s7 = int_to_ptr.vmem [resolvable:$true] %s14_s7 }
   0x3   :  { %s70_s8 = scalar_lea.vmem %s15_s7, 1024  ;;  %p75_p1 = scmp.lt.s32.totalorder %s15_s7, %s15_s7 }
   0x4   :  { %p71_p0 = scmp.ne.s32.totalorder %s15_s7, %s70_s8  ;;  %p76_p2 = scmp.lt.s32.totalorder %s70_s8, %s70_s8 }
   0x6   :  { %p77_p3 = por %p76_p2, %p75_p1 }
   0x8   :  { %p78_p4 = pnand %p77_p3, %p71_p0 }
   0xa   :  { %81 = shalt.err (!%p78_p4)
}
   0xb   :  { %17 = dma.hbm_to_vmem [thread:$0]  %s124_s0, 1024, %s15_s7, [#allocation3]  }
   0xc   :  { %102 = dma.done.wait [#allocation3], 1024  }
   0xd   :  { %103 = vsyncadd [#allocation3], 4294966272  ;;  %v21_v0 = vld [vmem:[#allocation2] sm:$0xff]  ;;  %v22_v1 = vld [vmem:[#allocation2 + $0x8] sm:$0xff]  ;;  %s107_s11 = smov [#allocation5]  }
   0xe   :  { %v23_v2 = vld [vmem:[#allocation2 + $0x10] sm:$0xff]  ;;  %s51_s12 = sshll.u32 %s107_s11, 4  ;;  %v29_v3 = vadd.f32 %v21_v0, %v21_v0  ;;  %v30_v4 = vadd.f32 %v22_v1, %v22_v1  ;;  %v24_v6 = vld [vmem:[#allocation2 + $0x18] sm:$0xff]  ;;  %v25_v7 = vld [vmem:[#allocation2 + $0x20] sm:$0xff]  ;;  %s52_s12 = int_to_ptr.vmem [resolvable:$true] %s51_s12 }
   0xf   :  { %v31_v5 = vadd.f32 %v23_v2, %v23_v2  ;;  %v26_v8 = vld [vmem:[#allocation2 + $0x28] sm:$0xff]  ;;  %v32_v9 = vadd.f32 %v24_v6, %v24_v6  ;;  %v33_v10 = vadd.f32 %v25_v7, %v25_v7  ;;  %v27_v12 = vld [vmem:[#allocation2 + $0x30] sm:$0xff]  ;;  %v28_v13 = vld [vmem:[#allocation2 + $0x38] sm:$0xff]  ;;  %s82_s0 = scalar_lea.vmem %s52_s12, 1024  ;;  %p87_p6 = scmp.lt.s32.totalorder %s52_s12, %s52_s12 }
  0x10   :  { %v34_v11 = vadd.f32 %v26_v8, %v26_v8  ;;  %37 = vst [vmem:[#allocation5] sm:$0xff] %v29_v3  ;;  %38 = vst [vmem:[#allocation5 + $0x8] sm:$0xff] %v30_v4  ;;  %v35_v14 = vadd.f32 %v27_v12, %v27_v12  ;;  %v36_v15 = vadd.f32 %v28_v13, %v28_v13  ;;  %p83_p5 = scmp.ne.s32.totalorder %s52_s12, %s82_s0  ;;  %p88_p7 = scmp.lt.s32.totalorder %s82_s0, %s82_s0 }
  0x11   :  { %39 = vst [vmem:[#allocation5 + $0x10] sm:$0xff] %v31_v5  ;;  %40 = vst [vmem:[#allocation5 + $0x18] sm:$0xff] %v32_v9 }
  0x12   :  { %41 = vst [vmem:[#allocation5 + $0x20] sm:$0xff] %v33_v10  ;;  %42 = vst [vmem:[#allocation5 + $0x28] sm:$0xff] %v34_v11  ;;  %p89_p8 = por %p88_p7, %p87_p6 }
  0x13   :  { %43 = vst [vmem:[#allocation5 + $0x30] sm:$0xff] %v35_v14  ;;  %44 = vst [vmem:[#allocation5 + $0x38] sm:$0xff] %v36_v15 }
  0x14   :  { %p90_p9 = pnand %p89_p8, %p83_p5 }
  0x16   :  { %93 = shalt.err (!%p90_p9)
}
  0x17   :  { %54 = dma.vmem_to_hbm [thread:$0]  %s52_s12, 1024, %s125_s1, [#allocation4]  }
  0x18   :  { %104 = dma.done.wait [#allocation4], 1024  }
  0x19   :  { %105 = vsyncadd [#allocation4], 4294966272 }
  0x1a   :  { %58 = vsyncpa [#allocation3], 1 }
  0x1b   :  { %59 = vsyncpa [#allocation4], 1 }

</bundles_post_ra>
